<compile_context>
chip_gen: v5e
topology: v5e:2x2
jax: 0.10.0
libtpu: 0.0.40
codegen_flags: <defaults>
</compile_context>

<pallas_src>
import functools

import numpy as np
import jax
import jax.numpy as jnp
from jax.experimental import pallas as pl
from jax.experimental.pallas import tpu as pltpu

NEGATIVE_RATIO = 3.0
EPS = 1e-6

_LANE = 128
_MAX_TILE = 8192                    # max lanes per spatial tile
_MIN_TILES = 8                      # target >= 8 grid steps (v7x 2-TC sharding)
_VMEM_BUDGET = 12 * 1024 * 1024     # double-buffered working set cap (v5e: 16 MiB default)
_MAX_LOSS_BITS = 0x42C80000         # f32 bit pattern of 100.0 (BCE log-clamp ceiling)


def _balance_bce_kernel(pred_ref, gt_ref, mask_ref,
                        negval_ref, msum_ref, stats_ref, *maybe_loss_ref,
                        s_total: int, emit_loss: bool):
    """One (N, TS) spatial tile of the flattened (N, H*W) inputs.

    Outputs:
      negval_ref (N, TS): weighted-topk candidate values (0 at gt==1 positions).
      msum_ref   (1, TS): per-column mask count == candidate weight.
      stats_ref  (1, 8, 128): per-tile scalars at [0, 0, 0:3] =
                  (positive_count, positive_loss_sum, negative_count) partials.
      loss_ref   (N, TS): raw BCE loss map (only when emit_loss).
    """
    n, ts = pred_ref.shape

    # Ragged tail handled in-kernel (no host-side jnp.pad): columns past the
    # true spatial size get pred=0.5 / gt=0 / mask=0, i.e. finite logs and
    # zero weight; their out-of-bounds writes are dropped by Pallas anyway.
    col = jax.lax.broadcasted_iota(jnp.int32, (1, ts), 1) + pl.program_id(0) * ts
    valid = col < s_total

    pred = jnp.where(valid, pred_ref[...], 0.5)
    gt = jnp.where(valid, gt_ref[...], 0.0)
    mask = jnp.where(valid, mask_ref[...], 0.0)

    # F.binary_cross_entropy(reduction='none') with torch's log clamp at -100.
    # gt is binary, so a single clamped log through a select is exact.
    pos = gt > 0.5
    p_sel = jnp.where(pos, pred, 1.0 - pred)
    loss = -jnp.maximum(jnp.log(p_sel), -100.0)              # (N, TS), in [0, 100]

    # Candidates for the weighted top-k: value loss[i,s], weight m_sum[s].
    negval_ref[...] = jnp.where(pos, 0.0, loss)

    # Per-column partial reductions over the batch axis.
    m_sum = jnp.sum(mask, axis=0, keepdims=True)             # (1, TS)
    g_sum = jnp.sum(gt, axis=0, keepdims=True)
    lg_sum = jnp.sum(loss * gt, axis=0, keepdims=True)
    msum_ref[...] = m_sum

    # Per-tile scalars (exact small integers / f32 partial sums).
    pos_cnt = jnp.sum(g_sum * m_sum)
    pos_loss = jnp.sum(lg_sum * m_sum)
    neg_cnt = jnp.sum((float(n) - g_sum) * m_sum)

    lane = jax.lax.broadcasted_iota(jnp.int32, (1, 8, 128), 2)
    sub = jax.lax.broadcasted_iota(jnp.int32, (1, 8, 128), 1)
    row0 = sub == 0
    stats_ref[...] = jnp.where(
        row0 & (lane == 0), pos_cnt,
        jnp.where(row0 & (lane == 1), pos_loss,
                  jnp.where(row0 & (lane == 2), neg_cnt, 0.0)))

    if emit_loss:
        maybe_loss_ref[0][...] = loss


def _choose_tile(s, n, emit_loss):
    """Lane-dense spatial tile: as large as possible subject to
    (a) v5e's 16 MiB default scoped VMEM (double-buffered streams), and
    (b) at least _MIN_TILES grid steps so v7x can split the parallel axis."""
    streams = 4 + (1 if emit_loss else 0)       # pred/gt/mask/negval (+loss)
    per_col = streams * n * 4 * 2               # f32, double-buffered
    budget_cols = max(_LANE, (_VMEM_BUDGET // per_col) // _LANE * _LANE)
    target = -(-s // _MIN_TILES)
    target = max(_LANE, -(-target // _LANE) * _LANE)
    return max(_LANE, min(_MAX_TILE, budget_cols, target))


def _weighted_topk_sum(negval, weights, k):
    """Exact sum of the k largest values of the weighted multiset
    {negval[i, s] repeated weights[s] times}, without sorting.

    The k-th largest value t_k is located by bisection over the f32 bit
    pattern (monotone for non-negative floats); each probe is one fused
    compare*weight*reduce memory pass over `negval`."""
    w = weights[None, :]                                      # (1, S) int32

    def count_gt(t):
        return jnp.sum(jnp.where(negval > t, w, 0))           # int32, exact

    def body(_, carry):
        lo, hi = carry                                        # int32 bit patterns
        span = hi - lo
        mid = lo + span // 2
        t = jax.lax.bitcast_convert_type(mid, jnp.float32)
        descend = count_gt(t) < k                             # too few above mid
        new_lo = jnp.where(descend, lo, mid)
        new_hi = jnp.where(descend, mid, hi)
        keep = span <= 1
        return (jnp.where(keep, lo, new_lo), jnp.where(keep, hi, new_hi))

    lo0 = jnp.int32(-1)                       # virtual -inf (all values >= 0)
    hi0 = jnp.int32(_MAX_LOSS_BITS)           # loss <= 100.0 (clamped log)
    _, hi = jax.lax.fori_loop(0, 31, body, (lo0, hi0))
    t_k = jax.lax.bitcast_convert_type(hi, jnp.float32)       # exact k-th value

    sel_w = jnp.where(negval > t_k, w, 0)
    c_gt = jnp.sum(sel_w)                                     # strictly-greater count
    s_gt = jnp.sum(sel_w.astype(jnp.float32) * negval)        # strictly-greater sum
    topk = s_gt + (k - c_gt).astype(jnp.float32) * t_k
    return jnp.where(k > 0, topk, 0.0)


def _balance_bce_impl(pred, gt, mask, *, negative_ratio, eps, return_origin):
    n, c, h, w = pred.shape
    s = h * w
    pred2 = jnp.asarray(pred, jnp.float32).reshape(n, s)
    gt2 = jnp.asarray(gt, jnp.float32).reshape(n, s)
    mask2 = jnp.asarray(mask, jnp.float32).reshape(n, s)

    ts = _choose_tile(s, n, return_origin)
    num_tiles = -(-s // ts)

    io_spec = pl.BlockSpec((n, ts), lambda t: (0, t))
    msum_spec = pl.BlockSpec((1, ts), lambda t: (0, t))
    stats_spec = pl.BlockSpec((1, 8, 128), lambda t: (t, 0, 0))

    out_shape = [jax.ShapeDtypeStruct((n, s), jnp.float32),            # negval
                 jax.ShapeDtypeStruct((1, s), jnp.float32),            # m_sum
                 jax.ShapeDtypeStruct((num_tiles, 8, 128), jnp.float32)]
    out_specs = [io_spec, msum_spec, stats_spec]
    if return_origin:
        out_shape.append(jax.ShapeDtypeStruct((n, s), jnp.float32))    # loss map
        out_specs.append(io_spec)

    outs = pl.pallas_call(
        functools.partial(_balance_bce_kernel, s_total=s,
                          emit_loss=return_origin),
        grid=(num_tiles,),
        in_specs=[io_spec, io_spec, io_spec],
        out_specs=tuple(out_specs),
        out_shape=tuple(out_shape),
        compiler_params=pltpu.CompilerParams(
            dimension_semantics=("parallel",)),
    )(pred2, gt2, mask2)

    negval, msum, stats = outs[0], outs[1], outs[2]

    # Exact integer counts (mirrors torch's int(...) of the float sums); each
    # per-tile partial is an exact integer in f32 (<= N^2 * TS < 2^24).
    pos_count = jnp.sum(jnp.round(stats[:, 0, 0]).astype(jnp.int32))
    neg_total = jnp.sum(jnp.round(stats[:, 0, 2]).astype(jnp.int32))
    pos_loss_sum = jnp.sum(stats[:, 0, 1])

    if float(negative_ratio).is_integer():
        neg_limit = pos_count * jnp.int32(int(negative_ratio))
    else:
        neg_limit = jnp.floor(
            pos_count.astype(jnp.float32) * negative_ratio).astype(jnp.int32)
    negative_count = jnp.minimum(neg_total, neg_limit)

    weights = jnp.round(msum[0]).astype(jnp.int32)            # (S,) per-column weights
    neg_loss_sum = _weighted_topk_sum(negval, weights, negative_count)

    balance_loss = (pos_loss_sum + neg_loss_sum) / (
        pos_count.astype(jnp.float32) +
        negative_count.astype(jnp.float32) + eps)

    if return_origin:
        return balance_loss, outs[3].reshape(n, 1, h, w)
    return balance_loss


_balance_bce_jit = jax.jit(
    _balance_bce_impl,
    static_argnames=("negative_ratio", "eps", "return_origin"))


def balance_cross_entropy_loss(pred, gt, mask,
                               negative_ratio=NEGATIVE_RATIO, eps=EPS,
                               return_origin=False):
    """JAX/Pallas equivalent of BalanceCrossEntropyLoss.forward.

    pred: (N, 1, H, W), gt: (N, 1, H, W), mask: (N, H, W).  Returns the scalar
    balanced loss (and the raw BCE loss map when return_origin=True)."""
    return _balance_bce_jit(pred, gt, mask,
                            negative_ratio=float(negative_ratio),
                            eps=float(eps),
                            return_origin=bool(return_origin))


def _reference_numpy(pred, gt, mask, negative_ratio=NEGATIVE_RATIO, eps=EPS):
    """Pure NumPy port of the PyTorch forward (float64), for checking."""
    pred = pred.astype(np.float64)
    gt = gt.astype(np.float64)
    mask = mask.astype(np.float64)
    positive = (gt * mask).astype(np.uint8).astype(np.float64)      # (N,N,H,W)
    negative = ((1.0 - gt) * mask).astype(np.uint8).astype(np.float64)
    positive_count = int(positive.sum())
    negative_count = min(int(negative.sum()),
                         int(positive_count * negative_ratio))
    loss = -(gt * np.maximum(np.log(pred), -100.0)
             + (1.0 - gt) * np.maximum(np.log(1.0 - pred), -100.0))  # (N,1,H,W)
    positive_loss = loss * positive
    negative_loss = (loss * negative).reshape(-1)
    topk = np.sort(negative_loss)[::-1][:negative_count]
    bal = (positive_loss.sum() + topk.sum()) / (
        positive_count + negative_count + eps)
    return bal, loss


if __name__ == "__main__":
    key = jax.random.PRNGKey(0)
    k1, k2, k3 = jax.random.split(key, 3)
    N, H, W = 2, 16, 16

    pred = jax.nn.sigmoid(jax.random.normal(k1, (N, 1, H, W), jnp.float32))
    gt = (jax.random.uniform(k2, (N, 1, H, W)) > 0.5).astype(jnp.float32)
    mask = (jax.random.uniform(k3, (N, H, W)) > 0.3).astype(jnp.float32)

    out = balance_cross_entropy_loss(pred, gt, mask)
    out = jax.block_until_ready(out)

    ref, ref_loss = _reference_numpy(
        np.asarray(pred), np.asarray(gt), np.asarray(mask))
    assert np.allclose(float(out), float(ref), rtol=1e-4, atol=1e-5), (
        float(out), float(ref))

    # return_origin=True path: scalar + raw BCE loss map.
    out2, loss_map = balance_cross_entropy_loss(pred, gt, mask,
                                                return_origin=True)
    loss_map = jax.block_until_ready(loss_map)
    assert loss_map.shape == (N, 1, H, W)
    assert np.allclose(float(out2), float(ref), rtol=1e-4, atol=1e-5)
    assert np.allclose(np.asarray(loss_map), ref_loss, rtol=1e-3, atol=1e-5)

    # Ragged spatial size (H*W not a multiple of the 128-lane tile): exercises
    # the in-kernel tail masking (no host-side padding).
    H2, W2 = 16, 10
    p2 = jax.nn.sigmoid(jax.random.normal(k1, (N, 1, H2, W2), jnp.float32))
    g2 = (jax.random.uniform(k2, (N, 1, H2, W2)) > 0.5).astype(jnp.float32)
    m2 = (jax.random.uniform(k3, (N, H2, W2)) > 0.3).astype(jnp.float32)
    out3 = jax.block_until_ready(balance_cross_entropy_loss(p2, g2, m2))
    ref3, _ = _reference_numpy(np.asarray(p2), np.asarray(g2), np.asarray(m2))
    assert np.allclose(float(out3), float(ref3), rtol=1e-4, atol=1e-5), (
        float(out3), float(ref3))

    print("KERNEL_OK")
</pallas_src>

<mosaic_0001>
module attributes {stable_mosaic.version = 11 : i64} {
  func.func @_balance_bce_kernel(%arg0: i32, %arg1: memref<2x128xf32, #tpu.memory_space<vmem>>, %arg2: memref<2x128xf32, #tpu.memory_space<vmem>>, %arg3: memref<2x128xf32, #tpu.memory_space<vmem>>, %arg4: memref<2x128xf32, #tpu.memory_space<vmem>>, %arg5: memref<1x128xf32, #tpu.memory_space<vmem>>, %arg6: memref<1x8x128xf32, #tpu.memory_space<vmem>>) attributes {dimension_semantics = [#tpu.dimension_semantics<parallel>], iteration_bounds = array<i64: 2>, scalar_prefetch = 0 : i64, scratch_operands = 0 : i64, tpu.core_type = #tpu.core_type<tc>, window_params = [{transform_indices = @transform_0, window_bounds = array<i64: 2, 128>}, {transform_indices = @transform_1, window_bounds = array<i64: 2, 128>}, {transform_indices = @transform_2, window_bounds = array<i64: 2, 128>}, {transform_indices = @transform_3, window_bounds = array<i64: 2, 128>}, {transform_indices = @transform_4, window_bounds = array<i64: 1, 128>}, {transform_indices = @transform_5, window_bounds = array<i64: 1, 8, 128>}]} {
    %0 = tpu.iota {dimensions = array<i32: 1>} : vector<1x128xi32>
    %c128_i32 = arith.constant 128 : i32
    %1 = arith.muli %arg0, %c128_i32 : i32
    %2 = vector.broadcast %1 : i32 to vector<1x128xi32>
    %3 = arith.addi %0, %2 : vector<1x128xi32>
    %c256_i32 = arith.constant 256 : i32
    %4 = vector.broadcast %c256_i32 : i32 to vector<1x128xi32>
    %5 = arith.cmpi slt, %3, %4 : vector<1x128xi32>
    %c0 = arith.constant 0 : index
    %c0_0 = arith.constant 0 : index
    %6 = vector.load %arg1[%c0, %c0_0] : memref<2x128xf32, #tpu.memory_space<vmem>>, vector<2x128xf32>
    %cst = arith.constant 5.000000e-01 : f32
    %7 = vector.shape_cast %5 : vector<1x128xi1> to vector<1x128xi1>
    %8 = vector.broadcast %7 : vector<1x128xi1> to vector<2x128xi1>
    %9 = vector.broadcast %cst : f32 to vector<2x128xf32>
    %10 = arith.select %8, %6, %9 : vector<2x128xi1>, vector<2x128xf32>
    %c0_1 = arith.constant 0 : index
    %c0_2 = arith.constant 0 : index
    %11 = vector.load %arg2[%c0_1, %c0_2] : memref<2x128xf32, #tpu.memory_space<vmem>>, vector<2x128xf32>
    %cst_3 = arith.constant 0.000000e+00 : f32
    %12 = vector.shape_cast %5 : vector<1x128xi1> to vector<1x128xi1>
    %13 = vector.broadcast %12 : vector<1x128xi1> to vector<2x128xi1>
    %14 = vector.broadcast %cst_3 : f32 to vector<2x128xf32>
    %15 = arith.select %13, %11, %14 : vector<2x128xi1>, vector<2x128xf32>
    %c0_4 = arith.constant 0 : index
    %c0_5 = arith.constant 0 : index
    %16 = vector.load %arg3[%c0_4, %c0_5] : memref<2x128xf32, #tpu.memory_space<vmem>>, vector<2x128xf32>
    %cst_6 = arith.constant 0.000000e+00 : f32
    %17 = vector.shape_cast %5 : vector<1x128xi1> to vector<1x128xi1>
    %18 = vector.broadcast %17 : vector<1x128xi1> to vector<2x128xi1>
    %19 = vector.broadcast %cst_6 : f32 to vector<2x128xf32>
    %20 = arith.select %18, %16, %19 : vector<2x128xi1>, vector<2x128xf32>
    %cst_7 = arith.constant 5.000000e-01 : f32
    %21 = vector.broadcast %cst_7 : f32 to vector<2x128xf32>
    %22 = arith.cmpf ogt, %15, %21 : vector<2x128xf32>
    %cst_8 = arith.constant 1.000000e+00 : f32
    %23 = vector.broadcast %cst_8 : f32 to vector<2x128xf32>
    %24 = arith.subf %23, %10 : vector<2x128xf32>
    %25 = arith.select %22, %10, %24 : vector<2x128xi1>, vector<2x128xf32>
    %26 = math.log %25 : vector<2x128xf32>
    %cst_9 = arith.constant -1.000000e+02 : f32
    %27 = vector.broadcast %cst_9 : f32 to vector<2x128xf32>
    %28 = arith.maximumf %26, %27 : vector<2x128xf32>
    %cst_10 = arith.constant 0.000000e+00 : f32
    %29 = vector.broadcast %cst_10 : f32 to vector<2x128xf32>
    %30 = arith.subf %29, %28 : vector<2x128xf32>
    %cst_11 = arith.constant 0.000000e+00 : f32
    %31 = vector.broadcast %cst_11 : f32 to vector<2x128xf32>
    %32 = arith.select %22, %31, %30 : vector<2x128xi1>, vector<2x128xf32>
    %c0_12 = arith.constant 0 : index
    %c0_13 = arith.constant 0 : index
    %33 = vector.load %arg4[%c0_12, %c0_13] : memref<2x128xf32, #tpu.memory_space<vmem>>, vector<2x128xf32>
    tpu.vector_store %arg4[%c0_12, %c0_13], %32 {strides = array<i32>} : memref<2x128xf32, #tpu.memory_space<vmem>>, vector<2x128xf32>,
    %cst_14 = arith.constant dense<0.000000e+00> : vector<128xf32>
    %34 = vector.multi_reduction <add>, %20, %cst_14 [0] : vector<2x128xf32> to vector<128xf32>
    %35 = vector.shape_cast %34 : vector<128xf32> to vector<1x128xf32>
    %cst_15 = arith.constant dense<0.000000e+00> : vector<128xf32>
    %36 = vector.multi_reduction <add>, %15, %cst_15 [0] : vector<2x128xf32> to vector<128xf32>
    %37 = vector.shape_cast %36 : vector<128xf32> to vector<1x128xf32>
    %38 = arith.mulf %30, %15 : vector<2x128xf32>
    %cst_16 = arith.constant dense<0.000000e+00> : vector<128xf32>
    %39 = vector.multi_reduction <add>, %38, %cst_16 [0] : vector<2x128xf32> to vector<128xf32>
    %40 = vector.shape_cast %39 : vector<128xf32> to vector<1x128xf32>
    %c0_17 = arith.constant 0 : index
    %c0_18 = arith.constant 0 : index
    %41 = vector.load %arg5[%c0_17, %c0_18] : memref<1x128xf32, #tpu.memory_space<vmem>>, vector<1x128xf32>
    tpu.vector_store %arg5[%c0_17, %c0_18], %35 {strides = array<i32>} : memref<1x128xf32, #tpu.memory_space<vmem>>, vector<1x128xf32>,
    %42 = arith.mulf %37, %35 : vector<1x128xf32>
    %43 = vector.shape_cast %42 : vector<1x128xf32> to vector<1x1x128xf32>
    %cst_19 = arith.constant dense<0.000000e+00> : vector<1xf32>
    %44 = vector.multi_reduction <add>, %43, %cst_19 [1, 2] : vector<1x1x128xf32> to vector<1xf32>
    %45 = vector.shape_cast %44 : vector<1xf32> to vector<1x1x1xf32>
    %46 = vector.extract %45[0, 0, 0] : f32 from vector<1x1x1xf32>
    %47 = arith.mulf %40, %35 : vector<1x128xf32>
    %48 = vector.shape_cast %47 : vector<1x128xf32> to vector<1x1x128xf32>
    %cst_20 = arith.constant dense<0.000000e+00> : vector<1xf32>
    %49 = vector.multi_reduction <add>, %48, %cst_20 [1, 2] : vector<1x1x128xf32> to vector<1xf32>
    %50 = vector.shape_cast %49 : vector<1xf32> to vector<1x1x1xf32>
    %51 = vector.extract %50[0, 0, 0] : f32 from vector<1x1x1xf32>
    %cst_21 = arith.constant 2.000000e+00 : f32
    %52 = vector.broadcast %cst_21 : f32 to vector<1x128xf32>
    %53 = arith.subf %52, %37 : vector<1x128xf32>
    %54 = arith.mulf %53, %35 : vector<1x128xf32>
    %55 = vector.shape_cast %54 : vector<1x128xf32> to vector<1x1x128xf32>
    %cst_22 = arith.constant dense<0.000000e+00> : vector<1xf32>
    %56 = vector.multi_reduction <add>, %55, %cst_22 [1, 2] : vector<1x1x128xf32> to vector<1xf32>
    %57 = vector.shape_cast %56 : vector<1xf32> to vector<1x1x1xf32>
    %58 = vector.extract %57[0, 0, 0] : f32 from vector<1x1x1xf32>
    %59 = tpu.iota {dimensions = array<i32: 2>} : vector<1x8x128xi32>
    %60 = tpu.iota {dimensions = array<i32: 1>} : vector<1x8x128xi32>
    %c0_i32 = arith.constant 0 : i32
    %61 = vector.broadcast %c0_i32 : i32 to vector<1x8x128xi32>
    %62 = arith.cmpi eq, %60, %61 : vector<1x8x128xi32>
    %c0_i32_23 = arith.constant 0 : i32
    %63 = vector.broadcast %c0_i32_23 : i32 to vector<1x8x128xi32>
    %64 = arith.cmpi eq, %59, %63 : vector<1x8x128xi32>
    %65 = arith.andi %62, %64 : vector<1x8x128xi1>
    %c1_i32 = arith.constant 1 : i32
    %66 = vector.broadcast %c1_i32 : i32 to vector<1x8x128xi32>
    %67 = arith.cmpi eq, %59, %66 : vector<1x8x128xi32>
    %68 = arith.andi %62, %67 : vector<1x8x128xi1>
    %c2_i32 = arith.constant 2 : i32
    %69 = vector.broadcast %c2_i32 : i32 to vector<1x8x128xi32>
    %70 = arith.cmpi eq, %59, %69 : vector<1x8x128xi32>
    %71 = arith.andi %62, %70 : vector<1x8x128xi1>
    %cst_24 = arith.constant 0.000000e+00 : f32
    %72 = vector.broadcast %58 : f32 to vector<1x8x128xf32>
    %73 = vector.broadcast %cst_24 : f32 to vector<1x8x128xf32>
    %74 = arith.select %71, %72, %73 : vector<1x8x128xi1>, vector<1x8x128xf32>
    %75 = vector.broadcast %51 : f32 to vector<1x8x128xf32>
    %76 = arith.select %68, %75, %74 : vector<1x8x128xi1>, vector<1x8x128xf32>
    %77 = vector.broadcast %46 : f32 to vector<1x8x128xf32>
    %78 = arith.select %65, %77, %76 : vector<1x8x128xi1>, vector<1x8x128xf32>
    %c0_25 = arith.constant 0 : index
    %c0_26 = arith.constant 0 : index
    %c0_27 = arith.constant 0 : index
    %79 = vector.load %arg6[%c0_25, %c0_26, %c0_27] : memref<1x8x128xf32, #tpu.memory_space<vmem>>, vector<1x8x128xf32>
    tpu.vector_store %arg6[%c0_25, %c0_26, %c0_27], %78 {strides = array<i32>} : memref<1x8x128xf32, #tpu.memory_space<vmem>>, vector<1x8x128xf32>,
    return
  }
  func.func @transform_0(%arg0: i32) -> (i32, i32) {
    %c0_i32 = arith.constant 0 : i32
    %c0_i32_0 = arith.constant 0 : i32
    return %c0_i32, %arg0 : i32, i32
  }
  func.func @transform_1(%arg0: i32) -> (i32, i32) {
    %c0_i32 = arith.constant 0 : i32
    %c0_i32_0 = arith.constant 0 : i32
    return %c0_i32, %arg0 : i32, i32
  }
  func.func @transform_2(%arg0: i32) -> (i32, i32) {
    %c0_i32 = arith.constant 0 : i32
    %c0_i32_0 = arith.constant 0 : i32
    return %c0_i32, %arg0 : i32, i32
  }
  func.func @transform_3(%arg0: i32) -> (i32, i32) {
    %c0_i32 = arith.constant 0 : i32
    %c0_i32_0 = arith.constant 0 : i32
    return %c0_i32, %arg0 : i32, i32
  }
  func.func @transform_4(%arg0: i32) -> (i32, i32) {
    %c0_i32 = arith.constant 0 : i32
    %c0_i32_0 = arith.constant 0 : i32
    return %c0_i32, %arg0 : i32, i32
  }
  func.func @transform_5(%arg0: i32) -> (i32, i32, i32) {
    %c0_i32 = arith.constant 0 : i32
    %c0_i32_0 = arith.constant 0 : i32
    %c0_i32_1 = arith.constant 0 : i32
    return %arg0, %c0_i32, %c0_i32_0 : i32, i32, i32
  }
}

</mosaic_0001>

<bundles_post_ra>
// kernel: _balance_bce_impl.1
= control target key start
LH: loop header
LB: loop body
LE: loop exit
PB: predicated region body
PF: predicated region fallthrough
CT: control target
= control target key end

     0   :  { %s571_s18 = smov 0   ;;  %s627_s0 = inlined_call_operand.vmem [shape: f32[2,256], index: 0, kind: input, shape index: {}]   ;;  %s628_s1 = inlined_call_operand.vmem [shape: f32[2,256], index: 1, kind: input, shape index: {}]   ;;  %s629_s2 = inlined_call_operand.vmem [shape: f32[2,256], index: 2, kind: input, shape index: {}]   ;;  %s630_s3 = inlined_call_operand.vmem [shape: f32[2,256], index: 3, kind: output, shape index: {0}]   ;;  %s631_s4 = inlined_call_operand.vmem [shape: f32[1,256], index: 4, kind: output, shape index: {1}]   ;;  %s632_s5 = inlined_call_operand.vmem [shape: f32[2,8,128], index: 5, kind: output, shape index: {2}]  }
   0x1 LB: > { %s504_s19 = sadd.s32 4294967295, %s539_s18   ;;  %p508_p0 = scmp.ge.s32.totalorder %s539_s18, 1  ;;  %s539_s18 = sphi %s571_s18, %s16_s18  }
   0x2   : > { %p209_p1 = scmp.lt.s32.totalorder %s539_s18, 3 }
   0x4   : > { %p210_p2 = pnand %p508_p0, %p209_p1 }
   0x5   : > { %p250_p3 = scmp.lt.s32.totalorder (!%p210_p2), %s504_s19, 1  ;;  %s514_s20 = sshll.u32 (!%p210_p2), %s504_s19, 7 }
   0x6   : > { %213 = sbr.rel (%p210_p2) target bundleno = 237 (0xed), region = 32 }
   0xb   : > { %v273_v0 = vlaneseq  ;;  %v276_v1 = vstv %s514_s20  ;;  %s634_s19 = smov (!%p250_p3, %s504_s19), 1  ;;  %vm296_vm0 = vcmask 1041408   ;;  %vm321_vm3 = vcmask 1040384  }
   0xc   : > { %s585_s21 = sshll.u32 %s634_s19, 1  ;;  %s268_s8 = scalar_lea.vmem %s631_s4, %s634_s19 }
   0xd   : > { %v582_v2 = vand.u32 127, %v273_v0  ;;  %s257_s24 = scalar_lea.vmem %s628_s1, %s585_s21  ;;  %s261_s27 = scalar_lea.vmem %s629_s2, %s585_s21 }
   0xe   : > { %v283_v4 = vld [vmem:[%s257_s24] sm:$0x3]  ;;  %s253_s30 = scalar_lea.vmem %s627_s0, %s585_s21  ;;  %s265_s11 = scalar_lea.vmem %s630_s3, %s585_s21 }
   0xf   : > { %v277_v3 = vadd.s32 %v276_v1, %v582_v2  ;;  %v285_v5 = vld [vmem:[%s261_s27] sm:$0x3]  ;;  %vm362_vm5 = vcmp.eq.s32.totalorder %v582_v2, 2  ;;  %vm360_vm6 = vcmp.eq.s32.totalorder %v582_v2, 1  ;;  %vm358_vm7 = vcmp.eq.s32.totalorder %v582_v2, 0  ;;  %s513_s14 = sshll.u32 %s634_s19, 3 }
  0x10   : > { %v279_v8 = vld [vmem:[%s253_s30] sm:$0x3]  ;;  %s272_s20 = scalar_lea.vmem %s632_s5, %s513_s14 }
  0x11   : > { %vm278_vm1 = vcmp.lt.s32.totalorder %v277_v3, 256 }
  0x12   : > { %v284_v6 = vsel %vm278_vm1, %v283_v4, 0.0  ;;  %v286_v7 = vsel %vm278_vm1, %v285_v5, 0.0  ;;  %v282_v11 = vsel %vm278_vm1, %v279_v8, 0.5  ;;  %v356_v5 = vshrl.u32 %v273_v0, 7 }
  0x13   : > { %v297_v9 = vsel %vm296_vm0, %v286_v7, 0.0  ;;  %v304_v10 = vsel %vm296_vm0, %v284_v6, 0.0  ;;  %vm287_vm2 = vcmp.gt.f32.partialorder %v284_v6, 0.5  ;;  %v288_v14 = vsub.f32 1.0, %v282_v11 }
  0x14   : > { %v298_v12 = vrot.slane %v297_v9, 4  ;;  %v305_v13 = vrot.slane %v304_v10, 4  ;;  %vm357_vm4 = vcmp.eq.s32.totalorder %v356_v5, 0 }
  0x15   : > { %v289_v17 = vsel %vm287_vm2, %v282_v11, %v288_v14  ;;  %vm363_vm8 = vmand %vm357_vm4, %vm362_vm5 }
  0x16   : > { %v299_v15 = vadd.f32 %v298_v12, %v297_v9  ;;  %v306_v16 = vadd.f32 %v305_v13, %v304_v10  ;;  %531 = vlog2.f32 %v289_v17  ;;  %vm361_vm9 = vmand %vm357_vm4, %vm360_vm6 }
  0x17   : > { %vm359_vm10 = vmand %vm357_vm4, %vm358_vm7 }
  0x18   : > { %v300_v18 = vrot.slane %v299_v15, 2  ;;  %v307_v19 = vrot.slane %v306_v16, 2 }
  0x1a   : > { %v301_v20 = vadd.f32 %v300_v18, %v299_v15  ;;  %v308_v21 = vadd.f32 %v307_v19, %v306_v16 }
  0x1c   : > { %v302_v22 = vrot.slane %v301_v20, 1  ;;  %v309_v23 = vrot.slane %v308_v21, 1  ;;  %v532_v24 = vpop.eup %531 }
  0x1d   : > { %v291_v27 = vmul.f32 0.6931472, %v532_v24 }
  0x1e   : > { %v303_v25 = vadd.f32 %v302_v22, %v301_v20  ;;  %v310_v26 = vadd.f32 %v309_v23, %v308_v21 }
  0x1f   : > { %v292_v30 = vmax.f32 %v291_v27, -100.0 }
  0x20   : > { %319 = vst [vmem:[%s268_s8] sm:$0x1] %v303_v25  ;;  %v320_v28 = vmul.f32 %v310_v26, %v303_v25  ;;  %v343_v29 = vsub.f32 2.0, %v310_v26 }
  0x21   : > { %v293_v33 = vsub.f32 0.0, %v292_v30 }
  0x22   : > { %v322_v31 = vsel %vm321_vm3, %v320_v28, 0.0  ;;  %v344_v32 = vmul.f32 %v343_v29, %v303_v25 }
  0x23   : > { %323 = vadd.xlane.f32.xlu0 %v322_v31  ;;  %v311_v35 = vmul.f32 %v293_v33, %v284_v6  ;;  %v294_v36 = vsel %vm287_vm2, 0.0, %v293_v33 }
  0x24   : > { %v345_v34 = vsel %vm321_vm3, %v344_v32, 0.0  ;;  %295 = vst [vmem:[%s265_s11] sm:$0x3] %v294_v36 }
  0x25   : > { %346 = vadd.xlane.f32.xlu1 %v345_v34  ;;  %v312_v37 = vsel %vm296_vm0, %v311_v35, 0.0 }
  0x26   : > { %v313_v38 = vrot.slane %v312_v37, 4 }
  0x28   : > { %v314_v39 = vadd.f32 %v313_v38, %v312_v37 }
  0x2a   : > { %v315_v40 = vrot.slane %v314_v39, 2 }
  0x2c   : > { %v316_v41 = vadd.f32 %v315_v40, %v314_v39 }
  0x2e   : > { %v317_v42 = vrot.slane %v316_v41, 1 }
  0x30   : > { %v318_v43 = vadd.f32 %v317_v42, %v316_v41 }
  0x32   : > { %v332_v44 = vmul.f32 %v318_v43, %v303_v25 }
  0x34   : > { %v333_v45 = vsel %vm321_vm3, %v332_v44, 0.0 }
  0x35   : > { %334 = vadd.xlane.f32.xlu0 %v333_v45 }
  0x96   : > { %v324_v46 = vpop.xlane.xlu0 %323 }
  0x97   : > { %v325_v47 = vrot.slane %v324_v46, 4 }
  0x98   : > { %v347_v51 = vpop.xlane.xlu1 %346 }
  0x99   : > { %v326_v48 = vadd.f32 %v325_v47, %v324_v46  ;;  %v348_v53 = vrot.slane %v347_v51, 4 }
  0x9b   : > { %v327_v49 = vrot.slane %v326_v48, 2  ;;  %v349_v55 = vadd.f32 %v348_v53, %v347_v51 }
  0x9d   : > { %v328_v50 = vadd.f32 %v327_v49, %v326_v48  ;;  %v350_v56 = vrot.slane %v349_v55, 2 }
  0x9f   : > { %v329_v52 = vrot.slane %v328_v50, 1  ;;  %v351_v60 = vadd.f32 %v350_v56, %v349_v55 }
  0xa1   : > { %v330_v54 = vadd.f32 %v329_v52, %v328_v50  ;;  %v352_v63 = vrot.slane %v351_v60, 1 }
  0xa3   : > { %517 = vpush %v330_v54  ;;  %v353_v4 = vadd.f32 %v352_v63, %v351_v60 }
  0xa8   : > { %v335_v57 = vpop.xlane.xlu0 %334 }
  0xa9   : > { %v336_v58 = vrot.slane %v335_v57, 4 }
  0xab   : > { %v337_v59 = vadd.f32 %v336_v58, %v335_v57 }
  0xad   : > { %v338_v61 = vrot.slane %v337_v59, 2 }
  0xaf   : > { %v339_v62 = vadd.f32 %v338_v61, %v337_v59 }
  0xb1   : > { %v340_v1 = vrot.slane %v339_v62, 1 }
  0xb3   : > { %v341_v3 = vadd.f32 %v340_v1, %v339_v62 }
  0xb5   : > { %519 = vpush %v341_v3 }
  0xb6   : > { %521 = vpush %v353_v4 }
  0xd4   : > { %s518_s12 = spop %517 }
  0xd5   : > { %v368_v8 = vstv %s518_s12 }
  0xe6   : > { %s520_s13 = spop %519 }
  0xe7   : > { %v366_v6 = vstv %s520_s13  ;;  %s522_s15 = spop %521 }
  0xe8   : > { %v364_v7 = vstv %s522_s15 }
  0xe9   : > { %v365_v0 = vsel %vm363_vm8, %v364_v7, 0.0 }
  0xea   : > { %v367_v9 = vsel %vm361_vm9, %v366_v6, %v365_v0 }
  0xeb   : > { %v369_v10 = vsel %vm359_vm10, %v368_v8, %v367_v9 }
  0xec   : > { %370 = vst [vmem:[%s272_s20] sm:$0xff] %v369_v10 }
  0xed PF: > { %s16_s18 = sadd.s32 1, %s539_s18  }
  0xee   : > { %p13_p4 = scmp.ge.s32.totalorder %s16_s18, 4  }
  0xf0   :  { %15 = sbr.rel (!%p13_p4) target bundleno = 1 (0x1), region = 92 }

</bundles_post_ra>
